<compile_context>
chip_gen: v7x
topology: tpu7x:2x2x1
jax: 0.10.0
libtpu: 0.0.40
codegen_flags: <defaults>
</compile_context>

<pallas_src>
import functools
import math

import jax
import jax.numpy as jnp
from jax.experimental import pallas as pl
from jax.experimental.pallas import tpu as pltpu

_LANE = 128


# ---------------------------------------------------------------------------
# small helpers
# ---------------------------------------------------------------------------
def _sublane(dtype):
    """Minimum sublane tile (second-to-last dim alignment) for a dtype."""
    itemsize = jnp.dtype(dtype).itemsize
    return max(8, 32 // max(itemsize, 1))       # f32 -> 8, bf16 -> 16, int8/fp8 -> 32


def _round_up(v, m):
    return ((v + m - 1) // m) * m


def _pad2d(a, rows, cols):
    pr, pc = rows - a.shape[0], cols - a.shape[1]
    if pr or pc:                                 # no-op when already aligned
        a = jnp.pad(a, ((0, pr), (0, pc)))
    return a


def _pick_tile(dim, pref, align):
    """Largest multiple of `align` that divides `dim` and is <= pref (dim % align == 0)."""
    t = max(min(pref, dim), align)
    t -= t % align
    while dim % t:
        t -= align
    return t


def _device_kind():
    try:
        return jax.devices()[0].device_kind.lower()
    except Exception:
        return ""


# ---------------------------------------------------------------------------
# kernels
# ---------------------------------------------------------------------------
def _linear_kernel_accout(x_ref, w_ref, b_ref, o_ref, *,
                          use_relu, compute_dtype, n_blocks_j):
    """f32 output: accumulate directly into the resident output block across K."""
    k = pl.program_id(2)

    @pl.when(k == 0)
    def _init():
        o_ref[...] = jnp.zeros_like(o_ref)

    xv = x_ref[...]
    wv = w_ref[...]
    if compute_dtype is not None:                # bf16 MXU path, f32 accumulation
        xv = xv.astype(compute_dtype)
        wv = wv.astype(compute_dtype)
    o_ref[...] += jnp.dot(xv, wv, preferred_element_type=jnp.float32)

    @pl.when(k == pl.num_programs(2) - 1)
    def _epilogue():
        tn = o_ref.shape[-1]
        if n_blocks_j == 1:                      # whole bias == this tile's bias
            b = b_ref[...]
        else:                                    # lane-aligned slice of resident bias
            j0 = pl.multiple_of(pl.program_id(1) * tn, _LANE)
            b = b_ref[:, pl.ds(j0, tn)]
        out = o_ref[...] + b.astype(jnp.float32)
        if use_relu:
            out = jnp.maximum(out, 0.0)
        o_ref[...] = out


def _linear_kernel_scratch(x_ref, w_ref, b_ref, o_ref, acc_ref, *,
                           use_relu, compute_dtype, n_blocks_j):
    """sub-f32 output: keep a f32 VMEM accumulator, cast only in the epilogue."""
    k = pl.program_id(2)

    @pl.when(k == 0)
    def _init():
        acc_ref[...] = jnp.zeros_like(acc_ref)

    xv = x_ref[...]
    wv = w_ref[...]
    if compute_dtype is not None:
        xv = xv.astype(compute_dtype)
        wv = wv.astype(compute_dtype)
    acc_ref[...] += jnp.dot(xv, wv, preferred_element_type=jnp.float32)

    @pl.when(k == pl.num_programs(2) - 1)
    def _epilogue():
        tn = o_ref.shape[-1]
        if n_blocks_j == 1:
            b = b_ref[...]
        else:
            j0 = pl.multiple_of(pl.program_id(1) * tn, _LANE)
            b = b_ref[:, pl.ds(j0, tn)]
        out = acc_ref[...] + b.astype(jnp.float32)
        if use_relu:
            out = jnp.maximum(out, 0.0)
        o_ref[...] = out.astype(o_ref.dtype)


# ---------------------------------------------------------------------------
# padded 2-D linear (core of FC / MLP)
# ---------------------------------------------------------------------------
def _linear_padded_2d(x_p, weight_t, bias, *, use_relu, compute_dtype=None,
                      tm=None, tn=None, tk=None):
    """y_p = relu?(x_p @ weight_t + bias) on already-aligned 2-D inputs.

    x_p:      [mp, kp]  with mp % sublane(x.dtype) == 0, kp % 128 == 0
    weight_t: [in_size | kp, out_size | np_]  ([in, out]; zero-padded if not aligned)
    bias:     [out_size] (unpadded; out_size is derived from it)
    Returns (y_p [mp, np_], out_size). Padded N columns of y_p are exactly 0 (zero
    weight cols + zero bias, relu(0) = 0), padded M rows are never read by callers.
    """
    mp, kp = x_p.shape
    out_size = bias.shape[0]
    np_ = _round_up(out_size, _LANE)
    out_dtype = x_p.dtype

    w_p = _pad2d(weight_t, kp, np_)              # no-op when pre-padded at init
    b_p = _pad2d(bias.reshape(1, -1), 1, np_)    # padded bias columns are 0 -> exact

    kind = _device_kind()
    is_v7 = ("v7" in kind) or ("tpu7" in kind)

    # Tile preferences: bigger re-use tiles on v5e/v6e (128 MiB VMEM), smaller on v7x
    # (64 MiB physical VMEM).  Tiles are then clamped to divisors of the aligned dims.
    if tm is None:
        tm = 512 if is_v7 else 1024
    if tn is None:
        tn = 512
    if tk is None:
        tk = 512

    tm_e = _pick_tile(mp, tm, _sublane(x_p.dtype))
    tn_e = _pick_tile(np_, tn, _LANE)
    tk_e = _pick_tile(kp, tk, _LANE)
    grid = (mp // tm_e, np_ // tn_e, kp // tk_e)

    x_b = jnp.dtype(x_p.dtype).itemsize
    w_b = jnp.dtype(w_p.dtype).itemsize
    o_b = jnp.dtype(out_dtype).itemsize
    b_b = jnp.dtype(b_p.dtype).itemsize

    acc_in_out = jnp.dtype(out_dtype) == jnp.dtype(jnp.float32)

    # VMEM footprint: double-buffered x / w / out tiles + resident bias
    # (+ f32 scratch only when the output dtype is not f32).
    tile_bytes = (
        2 * tm_e * tk_e * x_b
        + 2 * tk_e * tn_e * w_b
        + np_ * b_b
        + 2 * tm_e * tn_e * o_b
        + (0 if acc_in_out else tm_e * tn_e * 4)
    )
    vmem_cap = (52 << 20) if is_v7 else (96 << 20)
    vmem_limit = int(min(max(tile_bytes + (8 << 20), 24 << 20), vmem_cap))

    # Honest cost estimate: x is re-streamed once per N tile, w once per M tile.
    cost = pl.CostEstimate(
        flops=2 * mp * np_ * kp,
        transcendentals=0,
        bytes_accessed=int(mp * kp * x_b * grid[1]
                           + kp * np_ * w_b * grid[0]
                           + np_ * b_b
                           + mp * np_ * o_b),
    )

    # v7x has 2 TensorCores/chip: shard the M axis across them when possible.
    if (is_v7 and grid[0] >= 2
            and all(hasattr(pltpu, a) for a in ("CORE_PARALLEL", "PARALLEL", "ARBITRARY"))):
        dims = (pltpu.CORE_PARALLEL, pltpu.PARALLEL, pltpu.ARBITRARY)
    else:
        dims = ("parallel", "parallel", "arbitrary")

    common = dict(use_relu=use_relu, compute_dtype=compute_dtype, n_blocks_j=grid[1])
    if acc_in_out:
        kernel = functools.partial(_linear_kernel_accout, **common)
        scratch = []
    else:
        kernel = functools.partial(_linear_kernel_scratch, **common)
        scratch = [pltpu.VMEM((tm_e, tn_e), jnp.float32)]

    y_p = pl.pallas_call(
        kernel,
        out_shape=jax.ShapeDtypeStruct((mp, np_), out_dtype),
        grid_spec=pltpu.PrefetchScalarGridSpec(
            num_scalar_prefetch=0,
            grid=grid,
            in_specs=[
                pl.BlockSpec((tm_e, tk_e), lambda i, j, k: (i, k)),
                pl.BlockSpec((tk_e, tn_e), lambda i, j, k: (k, j)),
                pl.BlockSpec((1, np_), lambda i, j, k: (0, 0)),   # bias resident once
            ],
            out_specs=pl.BlockSpec((tm_e, tn_e), lambda i, j, k: (i, j)),
            scratch_shapes=scratch,
        ),
        compiler_params=pltpu.CompilerParams(
            dimension_semantics=dims,
            vmem_limit_bytes=vmem_limit,
        ),
        cost_estimate=cost,
    )(x_p, w_p, b_p)
    return y_p, out_size


# ---------------------------------------------------------------------------
# public wrappers (FC.forward / MLP.forward in eval mode)
# ---------------------------------------------------------------------------
def prepare_linear_params(weight, bias, *, weight_dtype=None):
    """One-time (init) prep of a PyTorch nn.Linear weight [out, in]:
    transpose to [in, out], zero-pad to (128, 128) alignment, optionally cast the
    weight (e.g. bf16 for the MXU fast path, halving weight HBM traffic)."""
    out_size, in_size = weight.shape
    w_t = jnp.asarray(weight.T)
    if weight_dtype is not None:
        w_t = w_t.astype(weight_dtype)
    w_t = _pad2d(w_t, _round_up(in_size, _LANE), _round_up(out_size, _LANE))
    return w_t, jnp.asarray(bias)


def linear_forward(x, weight_t, bias, *, use_relu=True, dropout=0.0,
                   compute_dtype=None, tm=None, tn=None, tk=None):
    """Fused y = relu?(x @ weight_t + bias), matching FC.forward in eval mode."""
    del dropout  # TODO(synk): training-mode dropout (pltpu.prng_* inverted mask) not applied; eval-mode Dropout is identity.
    in_size = x.shape[-1]
    lead = x.shape[:-1]
    m = 1
    for d in lead:
        m *= d
    x2d = x.reshape(m, in_size)

    mp = _round_up(m, _sublane(x.dtype))
    kp = _round_up(in_size, _LANE)
    x_p = _pad2d(x2d, mp, kp)                    # no-op when already aligned

    y_p, out_size = _linear_padded_2d(x_p, weight_t, bias, use_relu=use_relu,
                                      compute_dtype=compute_dtype, tm=tm, tn=tn, tk=tk)
    y = y_p if (y_p.shape[0] == m and y_p.shape[1] == out_size) else y_p[:m, :out_size]
    return y.reshape(*lead, out_size)


def mlp_forward(x, w1_t, b1, w2_t, b2, *, compute_dtype=None):
    """TCGE's MLP in eval mode: Linear+ReLU (FC) followed by Linear.
    The hidden activation stays padded on-device between the two layers
    (no slice -> re-pad HBM round trip; its padded columns are exactly 0)."""
    in_size = x.shape[-1]
    lead = x.shape[:-1]
    m = 1
    for d in lead:
        m *= d
    x2d = x.reshape(m, in_size)

    mp = _round_up(m, _sublane(x.dtype))
    kp = _round_up(in_size, _LANE)
    x_p = _pad2d(x2d, mp, kp)

    h_p, _ = _linear_padded_2d(x_p, w1_t, b1, use_relu=True, compute_dtype=compute_dtype)
    y_p, out_size = _linear_padded_2d(h_p, w2_t, b2, use_relu=False,
                                      compute_dtype=compute_dtype)
    y = y_p if (y_p.shape[0] == m and y_p.shape[1] == out_size) else y_p[:m, :out_size]
    return y.reshape(*lead, out_size)


# ---------------------------------------------------------------------------
# demo / correctness check
# ---------------------------------------------------------------------------
if __name__ == "__main__":
    key = jax.random.PRNGKey(0)
    k_x, k_w1, k_b1, k_w2, k_b2 = jax.random.split(key, 5)

    batch, seq, in_size, mid_size, out_size = 2, 8, 32, 64, 32

    x = jax.random.normal(k_x, (batch, seq, in_size), dtype=jnp.float32)

    # nn.Linear-style init: U(-1/sqrt(fan_in), 1/sqrt(fan_in)), PyTorch [out, in] layout.
    bound1 = 1.0 / math.sqrt(in_size)
    w1 = jax.random.uniform(k_w1, (mid_size, in_size), jnp.float32, -bound1, bound1)
    b1 = jax.random.uniform(k_b1, (mid_size,), jnp.float32, -bound1, bound1)
    bound2 = 1.0 / math.sqrt(mid_size)
    w2 = jax.random.uniform(k_w2, (out_size, mid_size), jnp.float32, -bound2, bound2)
    b2 = jax.random.uniform(k_b2, (out_size,), jnp.float32, -bound2, bound2)

    # One-time "model init": transpose + pad weights (f32 exact path).
    w1_t, b1_j = prepare_linear_params(w1, b1)
    w2_t, b2_j = prepare_linear_params(w2, b2)

    # FC (Linear + ReLU, eval-mode dropout = identity), f32 path.
    fc_out = linear_forward(x, w1_t, b1_j, use_relu=True, dropout=0.1)
    jax.block_until_ready(fc_out)
    fc_ref = jnp.maximum(jnp.einsum("bsi,oi->bso", x, w1) + b1, 0.0)
    assert fc_out.shape == (batch, seq, mid_size)
    assert jnp.allclose(fc_out, fc_ref, atol=1e-5, rtol=1e-5)

    # MLP (FC + Linear) as used by TCGE, f32 path.
    mlp_out = mlp_forward(x, w1_t, b1_j, w2_t, b2_j)
    jax.block_until_ready(mlp_out)
    mlp_ref = jnp.einsum("bsm,om->bso", fc_ref, w2) + b2
    assert mlp_out.shape == (batch, seq, out_size)
    assert jnp.allclose(mlp_out, mlp_ref, atol=1e-4, rtol=1e-4)

    # bf16 MXU path: weights stored bf16 once at init, f32 accumulation / epilogue.
    w1_tb, _ = prepare_linear_params(w1, b1, weight_dtype=jnp.bfloat16)
    w2_tb, _ = prepare_linear_params(w2, b2, weight_dtype=jnp.bfloat16)
    mlp_bf16 = mlp_forward(x, w1_tb, b1_j, w2_tb, b2_j, compute_dtype=jnp.bfloat16)
    jax.block_until_ready(mlp_bf16)
    assert mlp_bf16.shape == (batch, seq, out_size)
    assert jnp.allclose(mlp_bf16, mlp_ref, atol=1e-1, rtol=1e-1)

    print("KERNEL_OK")
</pallas_src>

<mosaic_0001>
module attributes {stable_mosaic.version = 11 : i64} {
  func.func @_linear_kernel_accout(%arg0: i32, %arg1: i32, %arg2: i32, %arg3: memref<16x128xf32, #tpu.memory_space<vmem>>, %arg4: memref<128x128xf32, #tpu.memory_space<vmem>>, %arg5: memref<1x128xf32, #tpu.memory_space<vmem>>, %arg6: memref<16x128xf32, #tpu.memory_space<vmem>>) attributes {dimension_semantics = [#tpu.dimension_semantics<parallel>, #tpu.dimension_semantics<parallel>, #tpu.dimension_semantics<arbitrary>], iteration_bounds = array<i64: 1, 1, 1>, scalar_prefetch = 0 : i64, scratch_operands = 0 : i64, tpu.core_type = #tpu.core_type<tc>, window_params = [{transform_indices = @transform_0, window_bounds = array<i64: 16, 128>}, {transform_indices = @transform_1, window_bounds = array<i64: 128, 128>}, {pipeline_mode = #tpu.pipeline_mode<synchronous>, transform_indices = @transform_2, window_bounds = array<i64: 1, 128>}, {transform_indices = @transform_3, window_bounds = array<i64: 16, 128>}]} {
    %c0_i32 = arith.constant 0 : i32
    %0 = arith.cmpi eq, %arg2, %c0_i32 : i32
    %1 = arith.extui %0 : i1 to i32
    %c0_i32_0 = arith.constant 0 : i32
    %2 = arith.cmpi ne, %1, %c0_i32_0 : i32
    scf.if %2 {
      %cst_10 = arith.constant 0.000000e+00 : f32
      %12 = vector.broadcast %cst_10 : f32 to vector<16x128xf32>
      %c0_11 = arith.constant 0 : index
      %c0_12 = arith.constant 0 : index
      %13 = vector.load %arg6[%c0_11, %c0_12] : memref<16x128xf32, #tpu.memory_space<vmem>>, vector<16x128xf32>
      tpu.vector_store %arg6[%c0_11, %c0_12], %12 {strides = array<i32>} : memref<16x128xf32, #tpu.memory_space<vmem>>, vector<16x128xf32>,
    } else {
    }
    %c0 = arith.constant 0 : index
    %c0_1 = arith.constant 0 : index
    %3 = vector.load %arg3[%c0, %c0_1] : memref<16x128xf32, #tpu.memory_space<vmem>>, vector<16x128xf32>
    %c0_2 = arith.constant 0 : index
    %c0_3 = arith.constant 0 : index
    %4 = vector.load %arg4[%c0_2, %c0_3] : memref<128x128xf32, #tpu.memory_space<vmem>>, vector<128x128xf32>
    %c0_4 = arith.constant 0 : index
    %c0_5 = arith.constant 0 : index
    %5 = vector.load %arg6[%c0_4, %c0_5] : memref<16x128xf32, #tpu.memory_space<vmem>>, vector<16x128xf32>
    %cst = arith.constant dense<0.000000e+00> : vector<16x128xf32>
    %6 = tpu.matmul %3, %4, %cst {dimension_numbers = #tpu.dot_dimension_numbers<[1], [0], [0], [1], [0, 0, 1, 1], [], []>} : vector<16x128xf32>, vector<128x128xf32>, vector<16x128xf32> -> vector<16x128xf32>
    %7 = arith.addf %5, %6 : vector<16x128xf32>
    %c0_6 = arith.constant 0 : index
    %c0_7 = arith.constant 0 : index
    %8 = vector.load %arg6[%c0_6, %c0_7] : memref<16x128xf32, #tpu.memory_space<vmem>>, vector<16x128xf32>
    tpu.vector_store %arg6[%c0_6, %c0_7], %7 {strides = array<i32>} : memref<16x128xf32, #tpu.memory_space<vmem>>, vector<16x128xf32>,
    %c0_i32_8 = arith.constant 0 : i32
    %9 = arith.cmpi eq, %arg2, %c0_i32_8 : i32
    %10 = arith.extui %9 : i1 to i32
    %c0_i32_9 = arith.constant 0 : i32
    %11 = arith.cmpi ne, %10, %c0_i32_9 : i32
    scf.if %11 {
      %c0_10 = arith.constant 0 : index
      %c0_11 = arith.constant 0 : index
      %12 = vector.load %arg5[%c0_10, %c0_11] : memref<1x128xf32, #tpu.memory_space<vmem>>, vector<1x128xf32>
      %c0_12 = arith.constant 0 : index
      %c0_13 = arith.constant 0 : index
      %13 = vector.load %arg6[%c0_12, %c0_13] : memref<16x128xf32, #tpu.memory_space<vmem>>, vector<16x128xf32>
      %14 = vector.broadcast %12 : vector<1x128xf32> to vector<16x128xf32>
      %15 = arith.addf %13, %14 : vector<16x128xf32>
      %cst_14 = arith.constant 0.000000e+00 : f32
      %16 = vector.broadcast %cst_14 : f32 to vector<16x128xf32>
      %17 = arith.maximumf %15, %16 : vector<16x128xf32>
      %c0_15 = arith.constant 0 : index
      %c0_16 = arith.constant 0 : index
      %18 = vector.load %arg6[%c0_15, %c0_16] : memref<16x128xf32, #tpu.memory_space<vmem>>, vector<16x128xf32>
      tpu.vector_store %arg6[%c0_15, %c0_16], %17 {strides = array<i32>} : memref<16x128xf32, #tpu.memory_space<vmem>>, vector<16x128xf32>,
    } else {
    }
    return
  }
  func.func @transform_0(%arg0: i32, %arg1: i32, %arg2: i32) -> (i32, i32) {
    %c0_i32 = arith.constant 0 : i32
    return %arg0, %arg2 : i32, i32
  }
  func.func @transform_1(%arg0: i32, %arg1: i32, %arg2: i32) -> (i32, i32) {
    %c0_i32 = arith.constant 0 : i32
    return %arg2, %arg1 : i32, i32
  }
  func.func @transform_2(%arg0: i32, %arg1: i32, %arg2: i32) -> (i32, i32) {
    %c0_i32 = arith.constant 0 : i32
    %c0_i32_0 = arith.constant 0 : i32
    %c0_i32_1 = arith.constant 0 : i32
    return %c0_i32, %c0_i32_0 : i32, i32
  }
  func.func @transform_3(%arg0: i32, %arg1: i32, %arg2: i32) -> (i32, i32) {
    %c0_i32 = arith.constant 0 : i32
    return %arg0, %arg1 : i32, i32
  }
}

</mosaic_0001>

<bundles_post_ra>
// kernel: tpu_custom_call.1
= control target key start
LH: loop header
LB: loop body
LE: loop exit
PB: predicated region body
PF: predicated region fallthrough
CT: control target
= control target key end

     0   :  { %8 = vsyncpa [#allocation3], 0  ;;  %s421_s0 = inlined_call_operand.hbm [shape: f32[16,128], index: 0, kind: input, shape index: {}]   ;;  %s422_s1 = inlined_call_operand.hbm [shape: f32[128,128], index: 1, kind: input, shape index: {}]   ;;  %s423_s2 = inlined_call_operand.vmem [shape: f32[1,128], index: 2, kind: input, shape index: {}]   ;;  %s424_s3 = inlined_call_operand.hbm [shape: f32[16,128], index: 3, kind: output, shape index: {}]  }
   0x1   :  { %9 = vsyncpa [#allocation6], 0 }
   0x2   :  { %10 = vsyncpa [#allocation4], 0  ;;  %s348_s12 = smov [#allocation2]   ;;  %s276_s16 = scalar_lea.hbm %s421_s0, 256 }
   0x3   :  { %s16_s13 = sshll.u32 %s348_s12, 4  ;;  %p277_p0 = scmp.ne.s32.totalorder %s421_s0, %s276_s16  ;;  %s17_s13 = int_to_ptr.vmem [resolvable:$true] %s16_s13 }
   0x4   :  { %p280_p1 = scmp.lt.u32.totalorder %s276_s16, %s421_s0 }
   0x6   :  { %p282_p2 = pnand %p280_p1, %p277_p0 }
   0x8   :  { %285 = shalt.err (!%p282_p2)
}
   0x9   :  { %s286_s21 = scalar_lea.vmem %s17_s13, 256  ;;  %p291_p4 = scmp.lt.s32.totalorder %s17_s13, %s17_s13 }
   0xa   :  { %p287_p3 = scmp.ne.s32.totalorder %s17_s13, %s286_s21  ;;  %p292_p5 = scmp.lt.s32.totalorder %s286_s21, %s286_s21 }
   0xc   :  { %p293_p6 = por %p292_p5, %p291_p4 }
   0xe   :  { %p294_p7 = pnand %p293_p6, %p287_p3 }
  0x10   :  { %297 = shalt.err (!%p294_p7)
}
  0x11   :  { %s349_s22 = smov 128   ;;  %s350_s23 = smov 8  }
  0x12   :  { %22 = dma.hbm_to_vmem [thread:$0]  %s421_s0, 256, %s17_s13, [#allocation3], %s349_s22, %s349_s22, %s350_s23  }
  0x13   :  { %s351_s26 = smov [#allocation5]   ;;  %s298_s30 = scalar_lea.hbm %s422_s1, 2048 }
  0x14   :  { %s28_s27 = sshll.u32 %s351_s26, 4  ;;  %p299_p8 = scmp.ne.s32.totalorder %s422_s1, %s298_s30  ;;  %s29_s27 = int_to_ptr.vmem [resolvable:$true] %s28_s27 }
  0x15   :  { %p302_p9 = scmp.lt.u32.totalorder %s298_s30, %s422_s1 }
  0x17   :  { %p304_p10 = pnand %p302_p9, %p299_p8 }
  0x19   :  { %307 = shalt.err (!%p304_p10)
}
  0x1a   :  { %s308_s8 = scalar_lea.vmem %s29_s27, 2048  ;;  %p313_p12 = scmp.lt.s32.totalorder %s29_s27, %s29_s27 }
  0x1b   :  { %p309_p11 = scmp.ne.s32.totalorder %s29_s27, %s308_s8  ;;  %p314_p13 = scmp.lt.s32.totalorder %s308_s8, %s308_s8 }
  0x1d   :  { %p315_p0 = por %p314_p13, %p313_p12 }
  0x1f   :  { %p316_p1 = pnand %p315_p0, %p309_p11 }
  0x21   :  { %319 = shalt.err (!%p316_p1)
}
  0x22   :  { %34 = dma.hbm_to_vmem [thread:$0]  %s422_s1, 2048, %s29_s27, [#allocation6], %s349_s22, %s349_s22, %s350_s23  }
  0x23   :  { %342 = dma.done.wait [#allocation3], 256  }
  0x24   :  { %343 = vsyncadd [#allocation3], 4294967040 }
  0x25   :  { %344 = dma.done.wait [#allocation6], 2048  }
  0x26   :  { %345 = vsyncadd [#allocation6], 4294965248  ;;  %v51_v0 = vld [vmem:[#allocation5] sm:$0xff]  ;;  %v52_v1 = vld [vmem:[#allocation5 + $0x8] sm:$0xff]  ;;  %s352_s11 = smov [#allocation7]  }
  0x27   :  { %v53_v2 = vld [vmem:[#allocation5 + $0x10] sm:$0xff]  ;;  %v238_v3 = vpack.c.bf16 %v52_v1, %v51_v0  ;;  %v54_v4 = vld [vmem:[#allocation5 + $0x18] sm:$0xff]  ;;  %v55_v6 = vld [vmem:[#allocation5 + $0x20] sm:$0xff]  ;;  %s171_s12 = sshll.u32 %s352_s11, 4  ;;  %s172_s12 = int_to_ptr.vmem [resolvable:$true] %s171_s12 }
  0x28   :  { %v242_v5 = vpack.c.bf16 %v54_v4, %v53_v2  ;;  %v56_v7 = vld [vmem:[#allocation5 + $0x28] sm:$0xff]  ;;  %v49_v9 = vld [vmem:[#allocation2] sm:$0xff]  ;;  %v58_v11 = vld [vmem:[#allocation5 + $0x38] sm:$0xff]  ;;  %s320_s13 = scalar_lea.vmem %s172_s12, 256  ;;  %p325_p3 = scmp.lt.s32.totalorder %s172_s12, %s172_s12 }
  0x29   :  { %239 = vmatprep.subr.bf16.mxu0 %v238_v3  ;;  %v246_v8 = vpack.c.bf16 %v56_v7, %v55_v6  ;;  %v57_v10 = vld [vmem:[#allocation5 + $0x30] sm:$0xff]  ;;  %235 = vmatprep.mubr.f32.mxu0 %v49_v9  ;;  %v59_v13 = vld [vmem:[#allocation5 + $0x40] sm:$0xff]  ;;  %v60_v14 = vld [vmem:[#allocation5 + $0x48] sm:$0xff]  ;;  %p321_p2 = scmp.ne.s32.totalorder %s172_s12, %s320_s13  ;;  %p326_p4 = scmp.lt.s32.totalorder %s320_s13, %s320_s13 }
  0x2a   :  { %241 = vmatpush3.bf16.msra.mxu0 %v238_v3  ;;  %v250_v12 = vpack.c.bf16 %v58_v11, %v57_v10  ;;  %v254_v15 = vpack.c.bf16 %v60_v14, %v59_v13  ;;  %v61_v16 = vld [vmem:[#allocation5 + $0x50] sm:$0xff]  ;;  %v62_v17 = vld [vmem:[#allocation5 + $0x58] sm:$0xff]  ;;  %v63_v19 = vld [vmem:[#allocation5 + $0x60] sm:$0xff] }
  0x2b   :  { %243 = vmatprep.subr.bf16.mxu0 %v242_v5  ;;  %v258_v18 = vpack.c.bf16 %v62_v17, %v61_v16  ;;  %v64_v20 = vld [vmem:[#allocation5 + $0x68] sm:$0xff]  ;;  %v65_v22 = vld [vmem:[#allocation5 + $0x70] sm:$0xff]  ;;  %v66_v23 = vld [vmem:[#allocation5 + $0x78] sm:$0xff]  ;;  %p327_p5 = por %p326_p4, %p325_p3 }
  0x2c   :  { %v262_v21 = vpack.c.bf16 %v64_v20, %v63_v19  ;;  %v266_v24 = vpack.c.bf16 %v66_v23, %v65_v22  ;;  %v50_v25 = vld [vmem:[#allocation2 + $0x8] sm:$0xff]  ;;  %v184_v27 = vld [vmem:[%s423_s2] ss:$0 sm:$0xff] }
  0x2d   :  { %p328_p6 = pnand %p327_p5, %p321_p2 }
  0x2e   :  { %245 = vmatpush3.bf16.msra.mxu0 %v242_v5 }
  0x2f   :  { %247 = vmatprep.subr.bf16.mxu0 %v246_v8 }
  0x32   :  { %249 = vmatpush3.bf16.msra.mxu0 %v246_v8 }
  0x33   :  { %251 = vmatprep.subr.bf16.mxu0 %v250_v12 }
  0x36   :  { %253 = vmatpush3.bf16.msra.mxu0 %v250_v12 }
  0x37   :  { %255 = vmatprep.subr.bf16.mxu0 %v254_v15 }
  0x3a   :  { %257 = vmatpush3.bf16.msra.mxu0 %v254_v15 }
  0x3b   :  { %259 = vmatprep.subr.bf16.mxu0 %v258_v18 }
  0x3e   :  { %261 = vmatpush3.bf16.msra.mxu0 %v258_v18 }
  0x3f   :  { %263 = vmatprep.subr.bf16.mxu0 %v262_v21 }
  0x42   :  { %265 = vmatpush3.bf16.msra.mxu0 %v262_v21 }
  0x43   :  { %267 = vmatprep.subr.bf16.mxu0 %v266_v24 }
  0x46   :  { %269 = vmatpush3.bf16.msra.mxu0 %v266_v24 }
  0x49   :  { %236 = vmatmul.mubr.f32.vlgmr.msra.gmra.mrb[0].mxu0 %v50_v25 }
 0x11c   :  { %v237_v26 = vpop.f32.mrb[0].mxu0 }
 0x11d   :  { %v135_v28 = vpop.f32.mrb[1].mxu0  ;;  %v161_v29 = vadd.f32 %v237_v26, %v184_v27 }
 0x11e   :  { %v160_v30 = vadd.f32 %v184_v27, %v135_v28 }
 0x11f   :  { %v163_v31 = vmax.f32 %v161_v29, 0.0 }
 0x120   :  { %v162_v32 = vmax.f32 %v160_v30, 0.0 }
 0x121   :  { %165 = vst [vmem:[#allocation7 + $0x8] sm:$0xff] %v163_v31 }
 0x122   :  { %164 = vst [vmem:[#allocation7] sm:$0xff] %v162_v32 }
 0x123   :  { %331 = shalt.err (!%p328_p6)
}
 0x124   :  { %s332_s2 = scalar_lea.hbm %s424_s3, 256 }
 0x125   :  { %p333_p7 = scmp.ne.s32.totalorder %s424_s3, %s332_s2  ;;  %p336_p8 = scmp.lt.u32.totalorder %s332_s2, %s424_s3 }
 0x127   :  { %p338_p9 = pnand %p336_p8, %p333_p7 }
 0x129   :  { %341 = shalt.err (!%p338_p9)
}
 0x12a   :  { %177 = dma.vmem_to_hbm [thread:$0]  %s172_s12, 256, %s424_s3, [#allocation4], %s349_s22, %s349_s22, %s350_s23  }
 0x12b   :  { %346 = dma.done.wait [#allocation4], 256  }
 0x12c   :  { %347 = vsyncadd [#allocation4], 4294967040 }
 0x12d   :  { %181 = vsyncpa [#allocation3], 1 }
 0x12e   :  { %182 = vsyncpa [#allocation6], 1 }
 0x12f   :  { %183 = vsyncpa [#allocation4], 1 }

</bundles_post_ra>
